<compile_context>
chip_gen: v5e
topology: v5e:2x2
jax: 0.10.0
libtpu: 0.0.40
codegen_flags: <defaults>
</compile_context>

<pallas_src>
import functools

import numpy as np
import jax
import jax.numpy as jnp
from jax.experimental import pallas as pl
from jax.experimental.pallas import tpu as pltpu


# ---------------------------------------------------------------------------
# Kernel
# ---------------------------------------------------------------------------
def _pe_kernel(x_ref, row0_ref, pe_ref, o_ref):
    """x_ref:   (Bt, S,   D)  batch tile of patch embeddings
       row0_ref:(1,  1,   D)  precomputed cls_token + pe[0] (batch invariant)
       pe_ref:  (1,  S,   D)  pe[1 : S+1]
       o_ref:   (Bt, S+1, D)
    """
    bt, _, d = x_ref.shape
    o_ref[:, 0:1, :] = jnp.broadcast_to(row0_ref[...], (bt, 1, d))
    o_ref[:, 1:, :] = x_ref[...] + pe_ref[...]


# ---------------------------------------------------------------------------
# Per-generation sizing helpers
# ---------------------------------------------------------------------------
def _vmem_params():
    """(working-set budget bytes, scoped vmem_limit_bytes) per TPU generation."""
    try:
        cap = int(pltpu.get_tpu_info().vmem_capacity_bytes)
    except Exception:  # device-info query only; conservative fallback
        cap = 64 << 20
    budget = min(cap * 3 // 8, 32 << 20)   # v7x (64 MiB) -> 24 MiB, v5e/v6e -> 32 MiB
    limit = min(cap // 2, 48 << 20)        # v7x -> 32 MiB, v5e/v6e -> 48 MiB
    return budget, limit


def _num_tensorcores():
    try:
        kind = jax.devices()[0].device_kind.lower()
    except Exception:
        return 1
    return 2 if ("v7" in kind or "7x" in kind) else 1


def _pick_batch_tile(B, S, D, itemsize, vmem_budget_bytes, num_tc):
    """Largest batch tile fitting the VMEM budget (with lane/sublane padding).

    Single-TC chips (v5e/v6e): one step if it fits -- grid steps are a serial
    loop there, so splitting only adds ~0.35 us/step overhead.
    v7x (2 TCs): keep >=2 'parallel' steps only when each step still moves a
    large (>=512 KiB) tile.  Bt is rounded to a divisor of B.
    """
    lanes = pl.cdiv(D, 128) * 128
    sub_x = pl.cdiv(S, 8) * 8
    sub_o = pl.cdiv(S + 1, 8) * 8
    per_b = (sub_x + sub_o) * lanes * itemsize * 2        # x + out blocks, double-buffered
    fixed = (8 + sub_x) * lanes * itemsize * 2            # row0 + pe_rest blocks
    cap = max(1, (vmem_budget_bytes - fixed) // per_b)
    cap = int(min(cap, B))

    if num_tc >= 2 and B >= 2:
        split = pl.cdiv(B, 2)
        split_bytes = min(split, cap) * (S + (S + 1)) * D * itemsize
        if split_bytes >= (512 << 10):
            cap = min(cap, split)

    for bt in range(cap, 0, -1):           # prefer a tile that divides B exactly
        if B % bt == 0:
            return bt
    return 1


# ---------------------------------------------------------------------------
# Forward (Pallas path)
# ---------------------------------------------------------------------------
def _positional_encoding_forward(x, row0, pe_rest):
    """x: (B, S, D); row0: (1, 1, D); pe_rest: (1, S, D) -> (B, S+1, D)."""
    B, S, D = x.shape
    seq_out = S + 1
    dtype = x.dtype
    itemsize = jnp.dtype(dtype).itemsize

    budget, vmem_limit = _vmem_params()
    Bt = _pick_batch_tile(B, S, D, itemsize, budget, _num_tensorcores())

    cost = pl.CostEstimate(
        flops=B * S * D,                    # one add per element
        transcendentals=0,
        bytes_accessed=(B * S * D + S * D + D + B * seq_out * D) * itemsize,
    )

    return pl.pallas_call(
        _pe_kernel,
        out_shape=jax.ShapeDtypeStruct((B, seq_out, D), dtype),
        grid_spec=pltpu.PrefetchScalarGridSpec(
            num_scalar_prefetch=0,
            grid=(pl.cdiv(B, Bt),),
            in_specs=[
                pl.BlockSpec((Bt, S, D), lambda b: (b, 0, 0)),   # x batch tile
                pl.BlockSpec((1, 1, D), lambda b: (0, 0, 0)),    # fused row 0 (grid-invariant)
                pl.BlockSpec((1, S, D), lambda b: (0, 0, 0)),    # pe[1:S+1]   (grid-invariant)
            ],
            out_specs=pl.BlockSpec((Bt, seq_out, D), lambda b: (b, 0, 0)),
        ),
        compiler_params=pltpu.CompilerParams(
            dimension_semantics=("parallel",),
            vmem_limit_bytes=int(vmem_limit),
        ),
        cost_estimate=cost,
    )(x, row0, pe_rest)


positional_encoding_forward = jax.jit(_positional_encoding_forward)


def positional_encoding_apply(x, row0, pe_rest):
    """Size-aware dispatch: toy widths (lanes <7% utilized, <1 MiB moved) are
    left to XLA fusion; real ViT widths (D multiple of 128) use the kernel."""
    B, S, D = x.shape
    moved_bytes = (B * S * D + B * (S + 1) * D) * jnp.dtype(x.dtype).itemsize
    if D % 128 != 0 or moved_bytes < (1 << 20):
        cls_b = jnp.broadcast_to(row0, (B, 1, D)).astype(x.dtype)
        return jnp.concatenate([cls_b, x + pe_rest], axis=1)
    return positional_encoding_forward(x, row0, pe_rest)


# ---------------------------------------------------------------------------
# Parameter construction
# ---------------------------------------------------------------------------
def init_positional_encoding_params(cls_token, pe, seq_len, dtype=jnp.float32):
    """Fold the batch-invariant pieces once at model init.
    Returns row0 = cls_token + pe[0]  (1,1,D)  and  pe_rest = pe[1:seq_len+1] (1,S,D)."""
    row0 = (cls_token + pe[:, 0:1, :]).astype(dtype)
    pe_rest = pe[:, 1:seq_len + 1, :].astype(dtype)
    return row0, pe_rest


def build_pe(max_seq_length, d_model, dtype=jnp.float32):
    """Matches the PyTorch double loop exactly."""
    pe = np.zeros((max_seq_length, d_model), dtype=np.float64)
    for pos in range(max_seq_length):
        for i in range(d_model):
            if i % 2 == 0:
                pe[pos][i] = np.sin(pos / 10000 ** (i / d_model))
            else:
                pe[pos][i] = np.cos(pos / 10000 ** ((i - 1) / d_model))
    return jnp.asarray(pe, dtype=dtype)[None, :, :]        # (1, max_seq_length, D)


# ---------------------------------------------------------------------------
# Test
# ---------------------------------------------------------------------------
if __name__ == "__main__":
    d_model = 9
    max_seq_length = 17      # pe buffer length (>= S+1)
    batch = 2
    seq = 8                  # number of patches

    key = jax.random.PRNGKey(0)
    k_cls, k_x = jax.random.split(key)

    # nn.Parameter(torch.randn(1, 1, d_model)) equivalent (deterministic)
    cls_token = jax.random.normal(k_cls, (1, 1, d_model), dtype=jnp.float32)
    pe = build_pe(max_seq_length, d_model)
    x = jax.random.normal(k_x, (batch, seq, d_model), dtype=jnp.float32)

    # "model init": fold batch-invariant params once
    row0, pe_rest = init_positional_encoding_params(cls_token, pe, seq, jnp.float32)

    # Exercise the Pallas kernel path explicitly (the dispatcher would route
    # this toy size to XLA fusion).
    out = positional_encoding_forward(x, row0, pe_rest)
    out = jax.block_until_ready(out)

    # reference check (plain JAX, mirrors the PyTorch forward)
    ref = jnp.concatenate(
        [jnp.broadcast_to(cls_token, (batch, 1, d_model)), x], axis=1
    ) + pe[:, : seq + 1, :]
    assert out.shape == (batch, seq + 1, d_model)
    np.testing.assert_allclose(np.asarray(out), np.asarray(ref), rtol=1e-6, atol=1e-6)

    # also sanity-check the size-aware dispatcher (XLA path at this size)
    out2 = jax.block_until_ready(positional_encoding_apply(x, row0, pe_rest))
    np.testing.assert_allclose(np.asarray(out2), np.asarray(ref), rtol=1e-6, atol=1e-6)

    print("KERNEL_OK")
</pallas_src>

<mosaic_0001>
module attributes {stable_mosaic.version = 11 : i64} {
  func.func @_pe_kernel(%arg0: i32, %arg1: memref<2x8x9xf32, #tpu.memory_space<vmem>>, %arg2: memref<1x1x9xf32, #tpu.memory_space<vmem>>, %arg3: memref<1x8x9xf32, #tpu.memory_space<vmem>>, %arg4: memref<2x9x9xf32, #tpu.memory_space<vmem>>) attributes {dimension_semantics = [#tpu.dimension_semantics<parallel>], iteration_bounds = array<i64: 1>, scalar_prefetch = 0 : i64, scratch_operands = 0 : i64, tpu.core_type = #tpu.core_type<tc>, window_params = [{transform_indices = @transform_0, window_bounds = array<i64: 2, 8, 9>}, {pipeline_mode = #tpu.pipeline_mode<synchronous>, transform_indices = @transform_1, window_bounds = array<i64: 1, 1, 9>}, {pipeline_mode = #tpu.pipeline_mode<synchronous>, transform_indices = @transform_2, window_bounds = array<i64: 1, 8, 9>}, {transform_indices = @transform_3, window_bounds = array<i64: 2, 9, 9>}]} {
    %c0 = arith.constant 0 : index
    %c0_0 = arith.constant 0 : index
    %c0_1 = arith.constant 0 : index
    %0 = vector.load %arg2[%c0, %c0_0, %c0_1] : memref<1x1x9xf32, #tpu.memory_space<vmem>>, vector<1x1x9xf32>
    %1 = vector.shape_cast %0 : vector<1x1x9xf32> to vector<1x1x9xf32>
    %2 = vector.broadcast %1 : vector<1x1x9xf32> to vector<2x1x9xf32>
    %c0_2 = arith.constant 0 : index
    %c0_3 = arith.constant 0 : index
    %c0_4 = arith.constant 0 : index
    %3 = vector.load %arg4[%c0_2, %c0_3, %c0_4] : memref<2x9x9xf32, #tpu.memory_space<vmem>>, vector<2x1x9xf32>
    tpu.vector_store %arg4[%c0_2, %c0_3, %c0_4], %2 {strides = array<i32>} : memref<2x9x9xf32, #tpu.memory_space<vmem>>, vector<2x1x9xf32>,
    %c0_5 = arith.constant 0 : index
    %c0_6 = arith.constant 0 : index
    %c0_7 = arith.constant 0 : index
    %4 = vector.load %arg1[%c0_5, %c0_6, %c0_7] : memref<2x8x9xf32, #tpu.memory_space<vmem>>, vector<2x8x9xf32>
    %c0_8 = arith.constant 0 : index
    %c0_9 = arith.constant 0 : index
    %c0_10 = arith.constant 0 : index
    %5 = vector.load %arg3[%c0_8, %c0_9, %c0_10] : memref<1x8x9xf32, #tpu.memory_space<vmem>>, vector<1x8x9xf32>
    %6 = vector.broadcast %5 : vector<1x8x9xf32> to vector<2x8x9xf32>
    %7 = arith.addf %4, %6 : vector<2x8x9xf32>
    %c0_11 = arith.constant 0 : index
    %c1 = arith.constant 1 : index
    %c0_12 = arith.constant 0 : index
    %8 = vector.load %arg4[%c0_11, %c1, %c0_12] : memref<2x9x9xf32, #tpu.memory_space<vmem>>, vector<2x8x9xf32>
    tpu.vector_store %arg4[%c0_11, %c1, %c0_12], %7 {strides = array<i32>} : memref<2x9x9xf32, #tpu.memory_space<vmem>>, vector<2x8x9xf32>,
    return
  }
  func.func @transform_0(%arg0: i32) -> (i32, i32, i32) {
    %c0_i32 = arith.constant 0 : i32
    %c0_i32_0 = arith.constant 0 : i32
    %c0_i32_1 = arith.constant 0 : i32
    return %arg0, %c0_i32, %c0_i32_0 : i32, i32, i32
  }
  func.func @transform_1(%arg0: i32) -> (i32, i32, i32) {
    %c0_i32 = arith.constant 0 : i32
    %c0_i32_0 = arith.constant 0 : i32
    %c0_i32_1 = arith.constant 0 : i32
    %c0_i32_2 = arith.constant 0 : i32
    return %c0_i32, %c0_i32_0, %c0_i32_1 : i32, i32, i32
  }
  func.func @transform_2(%arg0: i32) -> (i32, i32, i32) {
    %c0_i32 = arith.constant 0 : i32
    %c0_i32_0 = arith.constant 0 : i32
    %c0_i32_1 = arith.constant 0 : i32
    %c0_i32_2 = arith.constant 0 : i32
    return %c0_i32, %c0_i32_0, %c0_i32_1 : i32, i32, i32
  }
  func.func @transform_3(%arg0: i32) -> (i32, i32, i32) {
    %c0_i32 = arith.constant 0 : i32
    %c0_i32_0 = arith.constant 0 : i32
    %c0_i32_1 = arith.constant 0 : i32
    return %arg0, %c0_i32, %c0_i32_0 : i32, i32, i32
  }
}

</mosaic_0001>

<bundles_post_ra>
// kernel: _positional_encoding_forward.1
= control target key start
LH: loop header
LB: loop body
LE: loop exit
PB: predicated region body
PF: predicated region fallthrough
CT: control target
= control target key end

     0   :  { %8 = vsyncpa [#allocation3], 0  ;;  %s202_s0 = inlined_call_operand.hbm [shape: f32[2,8,9], index: 0, kind: input, shape index: {}]   ;;  %s203_s1 = inlined_call_operand.hbm [shape: f32[1,1,9], index: 1, kind: input, shape index: {}]   ;;  %s204_s2 = inlined_call_operand.hbm [shape: f32[1,8,9], index: 2, kind: input, shape index: {}]   ;;  %s205_s3 = inlined_call_operand.vmem [shape: f32[2,9,9], index: 3, kind: output, shape index: {}]  }
   0x1   :  { %9 = vsyncpa [#allocation5], 0  ;;  %s28_s14 = sshll.u32 %s203_s1, 4  ;;  %s156_s15 = smov [#allocation4]   ;;  %s29_s14 = int_to_ptr.hbm [resolvable:$true] %s28_s14 }
   0x2   :  { %s30_s16 = sshll.u32 %s156_s15, 4  ;;  %s14_s19 = sshll.u32 %s202_s0, 4  ;;  %s31_s16 = int_to_ptr.vmem [resolvable:$true] %s30_s16  ;;  %s15_s19 = int_to_ptr.hbm [resolvable:$true] %s14_s19 }
   0x3   :  { %33 = dma.hbm_to_vmem [thread:$0]  %s29_s14, 16, %s31_s16, [#allocation5]  }
   0x4   :  { %s157_s20 = smov [#allocation2]   ;;  %s158_s22 = smov 128  }
   0x5   :  { %s16_s21 = sshll.u32 %s157_s20, 4  ;;  %s159_s23 = smov 8   ;;  %s17_s21 = int_to_ptr.vmem [resolvable:$true] %s16_s21 }
   0x6   :  { %22 = dma.hbm_to_vmem [thread:$0]  %s15_s19, 256, %s17_s21, [#allocation3], %s158_s22, %s158_s22, %s159_s23  }
   0x7   :  { %s39_s1 = sshll.u32 %s204_s2, 4  ;;  %s160_s26 = smov [#allocation6]   ;;  %s40_s1 = int_to_ptr.hbm [resolvable:$true] %s39_s1 }
   0x8   :  { %s41_s27 = sshll.u32 %s160_s26, 4  ;;  %s42_s27 = int_to_ptr.vmem [resolvable:$true] %s41_s27 }
   0x9   :  { %44 = dma.hbm_to_vmem [thread:$0]  %s40_s1, 128, %s42_s27, [#allocation5]  }
   0xa   :  { %152 = dma.done.wait [#allocation3], 256  }
   0xb   :  { %153 = vsyncadd [#allocation3], 4294967040 }
   0xc   :  { %154 = dma.done.wait [#allocation5], 144  }
   0xd   :  { %155 = vsyncadd [#allocation5], 4294967152  ;;  %vm58_vm0 = vcmask 65536   ;;  %v57_v0 = vld [vmem:[#allocation4] sm:$0x1]  ;;  %v61_v1 = vld [vmem:[#allocation2] sm:$0xff] }
   0xe   :  { %v63_v2 = vld [vmem:[#allocation6] sm:$0xff]  ;;  %vm66_vm1 = vcmask 72704   ;;  %59 = vst.msk [vmem:[%s205_s3] sm:$0x1] %vm58_vm0, %v57_v0  ;;  %v62_v4 = vld [vmem:[#allocation2 + $0x8] sm:$0xff] }
   0xf   :  { %v64_v3 = vadd.f32 %v63_v2, %v61_v1  ;;  %60 = vst.msk [vmem:[%s205_s3 + $0x10] sm:$0x1] %vm58_vm0, %v57_v0  ;;  %v65_v5 = vadd.f32 %v63_v2, %v62_v4 }
  0x11   :  { %67 = vst.msk [vmem:[%s205_s3 + $0x1] sm:$0xff] %vm66_vm1, %v64_v3 }
  0x12   :  { %68 = vst.msk [vmem:[%s205_s3 + $0x11] sm:$0xff] %vm66_vm1, %v65_v5 }
  0x13   :  { %73 = vsyncpa [#allocation3], 1 }
  0x14   :  { %74 = vsyncpa [#allocation5], 1 }

</bundles_post_ra>
